<compile_context>
chip_gen: v7x
topology: tpu7x:2x2x1
jax: 0.10.0
libtpu: 0.0.40
codegen_flags: <defaults>
</compile_context>

<pallas_src>
from functools import partial

import jax
import jax.numpy as jnp
from jax.experimental import pallas as pl
from jax.experimental.pallas import tpu as pltpu


# --------------------------------------------------------------------------
# Kernels
# --------------------------------------------------------------------------
def _gem_image_kernel(p_ref, fast_ref, x_ref, o_ref, acc_ref, *,
                      inv_hw, eps, hw_total, t_hw, needs_mask):
    h = pl.program_id(2)

    @pl.when(h == 0)
    def _():
        acc_ref[...] = jnp.zeros_like(acc_ref)

    p = p_ref[0]                                    # scalar (SMEM)
    x = x_ref[...].astype(jnp.float32)              # (tc, t_hw)
    xc = jnp.maximum(x, eps)                        # clamp(min=eps) -> x > 0

    if needs_mask:                                  # ragged last HW tile
        lane = jax.lax.broadcasted_iota(jnp.int32, xc.shape, 1)
        valid = (lane + h * t_hw) < hw_total
    else:
        valid = None

    def _accumulate(xp):
        if valid is not None:
            xp = jnp.where(valid, xp, 0.0)
        acc_ref[...] += jnp.sum(xp, axis=-1, keepdims=True)   # (tc, 1)

    use_cube = fast_ref[0] == 1

    @pl.when(use_cube)                              # p == 3: VPU-only fast path
    def _():
        _accumulate(xc * xc * xc)

    @pl.when(jnp.logical_not(use_cube))             # general p: exp/log on EUP
    def _():
        _accumulate(jnp.exp(p * jnp.log(xc)))

    @pl.when(h == pl.num_programs(2) - 1)
    def _():
        mean = acc_ref[...] * inv_hw                # mean over the true HW
        o_ref[...] = jnp.exp(jnp.log(mean) / p).astype(o_ref.dtype)


def _gem_token_kernel(p_ref, fast_ref, x_ref, o_ref, acc_ref, *,
                      inv_l, eps, l_total, t_l, needs_mask):
    s = pl.program_id(1)

    @pl.when(s == 0)
    def _():
        acc_ref[...] = jnp.zeros_like(acc_ref)

    p = p_ref[0]
    x = x_ref[...].astype(jnp.float32)              # (t_l, C), C on lanes
    xc = jnp.maximum(x, eps)

    if needs_mask:                                  # ragged last token tile
        row = jax.lax.broadcasted_iota(jnp.int32, xc.shape, 0)
        valid = (row + s * t_l) < l_total
    else:
        valid = None

    def _accumulate(xp):
        if valid is not None:
            xp = jnp.where(valid, xp, 0.0)
        acc_ref[...] += jnp.sum(xp, axis=0, keepdims=True)    # (1, C)

    use_cube = fast_ref[0] == 1

    @pl.when(use_cube)
    def _():
        _accumulate(xc * xc * xc)

    @pl.when(jnp.logical_not(use_cube))
    def _():
        _accumulate(jnp.exp(p * jnp.log(xc)))

    @pl.when(s == pl.num_programs(1) - 1)
    def _():
        mean = acc_ref[...] * inv_l
        o_ref[...] = jnp.exp(jnp.log(mean) / p).astype(o_ref.dtype)


# --------------------------------------------------------------------------
# Wrappers
# --------------------------------------------------------------------------
def _gem_image(x3, p_arr, fast_arr, eps, budget_bytes, vmem_limit_bytes):
    N, C, HW = x3.shape
    itemsize = x3.dtype.itemsize

    # Channel tile: full C when small (always a legal block), else 512
    # (multiple of 8/16 sublanes); keeps block bytes bounded for huge C and
    # gives megacore a parallel axis when N is tiny.
    tc = C if C <= 512 else 512
    row_bytes = tc * itemsize

    if HW * row_bytes <= budget_bytes:
        t_hw = HW                                   # single full-extent block
        needs_mask = False
    else:
        t_hw = max(128, (budget_bytes // row_bytes) // 128 * 128)
        needs_mask = (HW % t_hw) != 0

    n_c = pl.cdiv(C, tc)
    n_hw = pl.cdiv(HW, t_hw)

    kernel = partial(_gem_image_kernel, inv_hw=1.0 / HW, eps=float(eps),
                     hw_total=HW, t_hw=t_hw, needs_mask=needs_mask)

    return pl.pallas_call(
        kernel,
        out_shape=jax.ShapeDtypeStruct((N, C, 1), x3.dtype),
        grid_spec=pltpu.PrefetchScalarGridSpec(
            num_scalar_prefetch=0,
            grid=(N, n_c, n_hw),
            in_specs=[
                pl.BlockSpec(memory_space=pltpu.MemorySpace.SMEM),     # p
                pl.BlockSpec(memory_space=pltpu.MemorySpace.SMEM),     # p==3 flag
                pl.BlockSpec((pl.Squeezed(), tc, t_hw), lambda n, c, h: (n, c, h)),
            ],
            out_specs=pl.BlockSpec((pl.Squeezed(), tc, 1), lambda n, c, h: (n, c, 0)),
            scratch_shapes=[pltpu.VMEM((tc, 1), jnp.float32)],         # f32 accumulator
        ),
        compiler_params=pltpu.CompilerParams(
            dimension_semantics=("parallel", "parallel", "arbitrary"),
            vmem_limit_bytes=vmem_limit_bytes,
        ),
        cost_estimate=pl.CostEstimate(
            flops=5 * N * C * HW,
            transcendentals=2 * N * C * HW,
            bytes_accessed=N * C * HW * itemsize + N * C * itemsize,
        ),
    )(p_arr, fast_arr, x3)


def _gem_tokens(x, p_arr, fast_arr, eps, budget_bytes, vmem_limit_bytes):
    N, L, C = x.shape
    itemsize = x.dtype.itemsize
    row_bytes = C * itemsize

    if L * row_bytes <= budget_bytes:
        t_l = L                                     # single full-extent block
        needs_mask = False
    else:
        t_l = max(8, (budget_bytes // row_bytes) // 8 * 8)
        needs_mask = (L % t_l) != 0

    n_l = pl.cdiv(L, t_l)

    kernel = partial(_gem_token_kernel, inv_l=1.0 / L, eps=float(eps),
                     l_total=L, t_l=t_l, needs_mask=needs_mask)

    return pl.pallas_call(
        kernel,
        out_shape=jax.ShapeDtypeStruct((N, 1, C), x.dtype),
        grid_spec=pltpu.PrefetchScalarGridSpec(
            num_scalar_prefetch=0,
            grid=(N, n_l),
            in_specs=[
                pl.BlockSpec(memory_space=pltpu.MemorySpace.SMEM),     # p
                pl.BlockSpec(memory_space=pltpu.MemorySpace.SMEM),     # p==3 flag
                pl.BlockSpec((pl.Squeezed(), t_l, C), lambda n, s: (n, s, 0)),
            ],
            out_specs=pl.BlockSpec((pl.Squeezed(), 1, C), lambda n, s: (n, 0, 0)),
            scratch_shapes=[pltpu.VMEM((1, C), jnp.float32)],
        ),
        compiler_params=pltpu.CompilerParams(
            dimension_semantics=("parallel", "arbitrary"),
            vmem_limit_bytes=vmem_limit_bytes,
        ),
        cost_estimate=pl.CostEstimate(
            flops=5 * N * L * C,
            transcendentals=2 * N * L * C,
            bytes_accessed=N * L * C * itemsize + N * C * itemsize,
        ),
    )(p_arr, fast_arr, x)


def gem_pool(x, p, *, eps=1e-6, work_with_tokens=False,
             block_budget_bytes=8 * 1024 * 1024,
             vmem_limit_bytes=32 * 1024 * 1024):
    """GeM pooling.

    x: (N, C, H, W), or (N, L, C) if work_with_tokens.
    p: learnable scalar parameter (shape (1,) or scalar).
    Returns (N, C, 1, 1), matching the PyTorch module in both modes.
    """
    p_arr = jnp.asarray(p, jnp.float32).reshape(1)
    fast_arr = (p_arr == 3.0).astype(jnp.int32)     # runtime p==3 fast-path flag

    if work_with_tokens:
        N, L, C = x.shape
        out = _gem_tokens(x, p_arr, fast_arr, eps, block_budget_bytes,
                          vmem_limit_bytes)         # (N, 1, C), lane-dense
        return out.reshape(N, C, 1, 1)
    else:
        N, C, H, W = x.shape
        x3 = x.reshape(N, C, H * W)
        out = _gem_image(x3, p_arr, fast_arr, eps, block_budget_bytes,
                         vmem_limit_bytes)          # (N, C, 1)
        return out.reshape(N, C, 1, 1)


# --------------------------------------------------------------------------
# Self-test
# --------------------------------------------------------------------------
if __name__ == "__main__":
    key = jax.random.PRNGKey(0)
    k1, k2, k3 = jax.random.split(key, 3)

    eps = 1e-6
    p3 = jnp.ones((1,), jnp.float32) * 3.0          # module default Parameter

    def ref_image(x, p):
        xc = jnp.maximum(x, eps)
        return jnp.mean(xc ** p[0], axis=(2, 3), keepdims=True) ** (1.0 / p[0])

    # 1) image path, p = 3 (pure-VPU fast path)
    x1 = jax.random.normal(k1, (2, 4, 16, 16), dtype=jnp.float32)
    y1 = jax.block_until_ready(gem_pool(x1, p3, eps=eps))
    assert y1.shape == (2, 4, 1, 1) and y1.dtype == x1.dtype
    assert jnp.allclose(y1, ref_image(x1, p3), atol=1e-5, rtol=5e-4)

    # 2) image path, non-integer p (general exp/log path)
    p25 = jnp.ones((1,), jnp.float32) * 2.5
    y2 = jax.block_until_ready(gem_pool(x1, p25, eps=eps))
    assert jnp.allclose(y2, ref_image(x1, p25), atol=1e-5, rtol=5e-4)

    # 3) image path, HW = 13*13 = 169 with a tiny forced block budget, so the
    #    ragged (lane-masked) multi-tile reduction path is exercised.
    x3 = jax.random.normal(k2, (2, 4, 13, 13), dtype=jnp.float32)
    y3 = jax.block_until_ready(gem_pool(x3, p3, eps=eps, block_budget_bytes=2048))
    assert jnp.allclose(y3, ref_image(x3, p3), atol=1e-5, rtol=5e-4)

    # 4) token path: x is (N, L, C); matches permute + avg_pool1d + unsqueeze(3)
    xt = jax.random.normal(k3, (2, 8, 32), dtype=jnp.float32)
    yt = jax.block_until_ready(gem_pool(xt, p3, eps=eps, work_with_tokens=True))
    xtc = jnp.maximum(xt, eps)
    ref_t = (jnp.mean(xtc ** p3[0], axis=1) ** (1.0 / p3[0])).reshape(2, 32, 1, 1)
    assert yt.shape == (2, 32, 1, 1) and yt.dtype == xt.dtype
    assert jnp.allclose(yt, ref_t, atol=1e-5, rtol=5e-4)

    print("KERNEL_OK")
</pallas_src>

<mosaic_0001>
module attributes {stable_mosaic.version = 11 : i64} {
  func.func @_gem_image_kernel(%arg0: i32, %arg1: i32, %arg2: i32, %arg3: memref<1xf32, #tpu.memory_space<smem>>, %arg4: memref<1xi32, #tpu.memory_space<smem>>, %arg5: memref<1x4x256xf32, #tpu.memory_space<vmem>>, %arg6: memref<1x4x1xf32, #tpu.memory_space<vmem>>, %arg7: memref<4x1xf32, #tpu.memory_space<vmem>>) attributes {dimension_semantics = [#tpu.dimension_semantics<parallel>, #tpu.dimension_semantics<parallel>, #tpu.dimension_semantics<arbitrary>], iteration_bounds = array<i64: 2, 1, 1>, scalar_prefetch = 0 : i64, scratch_operands = 1 : i64, tpu.core_type = #tpu.core_type<tc>, window_params = [{transform_indices = @transform_0, window_bounds = array<i64: 1>}, {transform_indices = @transform_1, window_bounds = array<i64: 1>}, {transform_indices = @transform_2, window_bounds = array<i64: 1, 4, 256>}, {transform_indices = @transform_3, window_bounds = array<i64: 1, 4, 1>}]} {
    %c0_i32 = arith.constant 0 : i32
    %0 = arith.cmpi eq, %arg2, %c0_i32 : i32
    %1 = arith.extui %0 : i1 to i32
    %c0_i32_0 = arith.constant 0 : i32
    %2 = arith.cmpi ne, %1, %c0_i32_0 : i32
    scf.if %2 {
      %cst_9 = arith.constant 0.000000e+00 : f32
      %18 = vector.broadcast %cst_9 : f32 to vector<4x1xf32>
      %c0_10 = arith.constant 0 : index
      %c0_11 = arith.constant 0 : index
      %19 = vector.load %arg7[%c0_10, %c0_11] : memref<4x1xf32, #tpu.memory_space<vmem>>, vector<4x1xf32>
      tpu.vector_store %arg7[%c0_10, %c0_11], %18 {strides = array<i32>} : memref<4x1xf32, #tpu.memory_space<vmem>>, vector<4x1xf32>,
    } else {
    }
    %c0 = arith.constant 0 : index
    %3 = memref.load %arg3[%c0] : memref<1xf32, #tpu.memory_space<smem>>
    %c0_1 = arith.constant 0 : index
    %c0_2 = arith.constant 0 : index
    %c0_3 = arith.constant 0 : index
    %4 = vector.load %arg5[%c0_1, %c0_2, %c0_3] : memref<1x4x256xf32, #tpu.memory_space<vmem>>, vector<1x4x256xf32>
    %5 = vector.shape_cast %4 : vector<1x4x256xf32> to vector<4x256xf32>
    %cst = arith.constant 9.99999997E-7 : f32
    %6 = vector.broadcast %cst : f32 to vector<4x256xf32>
    %7 = arith.maximumf %5, %6 : vector<4x256xf32>
    %c0_4 = arith.constant 0 : index
    %8 = memref.load %arg4[%c0_4] : memref<1xi32, #tpu.memory_space<smem>>
    %c1_i32 = arith.constant 1 : i32
    %9 = arith.cmpi eq, %8, %c1_i32 : i32
    %10 = arith.extui %9 : i1 to i32
    %c0_i32_5 = arith.constant 0 : i32
    %11 = arith.cmpi ne, %10, %c0_i32_5 : i32
    scf.if %11 {
      %18 = arith.mulf %7, %7 : vector<4x256xf32>
      %19 = arith.mulf %18, %7 : vector<4x256xf32>
      %c0_9 = arith.constant 0 : index
      %c0_10 = arith.constant 0 : index
      %20 = vector.load %arg7[%c0_9, %c0_10] : memref<4x1xf32, #tpu.memory_space<vmem>>, vector<4x1xf32>
      %cst_11 = arith.constant dense<0.000000e+00> : vector<4xf32>
      %21 = vector.multi_reduction <add>, %19, %cst_11 [1] : vector<4x256xf32> to vector<4xf32>
      %22 = vector.shape_cast %21 : vector<4xf32> to vector<4x1xf32>
      %23 = arith.addf %20, %22 : vector<4x1xf32>
      %c0_12 = arith.constant 0 : index
      %c0_13 = arith.constant 0 : index
      %24 = vector.load %arg7[%c0_12, %c0_13] : memref<4x1xf32, #tpu.memory_space<vmem>>, vector<4x1xf32>
      tpu.vector_store %arg7[%c0_12, %c0_13], %23 {strides = array<i32>} : memref<4x1xf32, #tpu.memory_space<vmem>>, vector<4x1xf32>,
    } else {
    }
    %true = arith.constant true
    %12 = arith.xori %9, %true : i1
    %13 = arith.extui %12 : i1 to i32
    %c0_i32_6 = arith.constant 0 : i32
    %14 = arith.cmpi ne, %13, %c0_i32_6 : i32
    scf.if %14 {
      %18 = math.log %7 : vector<4x256xf32>
      %19 = vector.broadcast %3 : f32 to vector<4x256xf32>
      %20 = arith.mulf %19, %18 : vector<4x256xf32>
      %21 = math.exp %20 : vector<4x256xf32>
      %c0_9 = arith.constant 0 : index
      %c0_10 = arith.constant 0 : index
      %22 = vector.load %arg7[%c0_9, %c0_10] : memref<4x1xf32, #tpu.memory_space<vmem>>, vector<4x1xf32>
      %cst_11 = arith.constant dense<0.000000e+00> : vector<4xf32>
      %23 = vector.multi_reduction <add>, %21, %cst_11 [1] : vector<4x256xf32> to vector<4xf32>
      %24 = vector.shape_cast %23 : vector<4xf32> to vector<4x1xf32>
      %25 = arith.addf %22, %24 : vector<4x1xf32>
      %c0_12 = arith.constant 0 : index
      %c0_13 = arith.constant 0 : index
      %26 = vector.load %arg7[%c0_12, %c0_13] : memref<4x1xf32, #tpu.memory_space<vmem>>, vector<4x1xf32>
      tpu.vector_store %arg7[%c0_12, %c0_13], %25 {strides = array<i32>} : memref<4x1xf32, #tpu.memory_space<vmem>>, vector<4x1xf32>,
    } else {
    }
    %c0_i32_7 = arith.constant 0 : i32
    %15 = arith.cmpi eq, %arg2, %c0_i32_7 : i32
    %16 = arith.extui %15 : i1 to i32
    %c0_i32_8 = arith.constant 0 : i32
    %17 = arith.cmpi ne, %16, %c0_i32_8 : i32
    scf.if %17 {
      %c0_9 = arith.constant 0 : index
      %c0_10 = arith.constant 0 : index
      %18 = vector.load %arg7[%c0_9, %c0_10] : memref<4x1xf32, #tpu.memory_space<vmem>>, vector<4x1xf32>
      %cst_11 = arith.constant 3.906250e-03 : f32
      %19 = vector.broadcast %cst_11 : f32 to vector<4x1xf32>
      %20 = arith.mulf %18, %19 : vector<4x1xf32>
      %21 = math.log %20 : vector<4x1xf32>
      %22 = vector.broadcast %3 : f32 to vector<4x1xf32>
      %23 = arith.divf %21, %22 : vector<4x1xf32>
      %24 = math.exp %23 : vector<4x1xf32>
      %c0_12 = arith.constant 0 : index
      %c0_13 = arith.constant 0 : index
      %c0_14 = arith.constant 0 : index
      %25 = vector.load %arg6[%c0_12, %c0_13, %c0_14] : memref<1x4x1xf32, #tpu.memory_space<vmem>>, vector<1x4x1xf32>
      %26 = vector.shape_cast %25 : vector<1x4x1xf32> to vector<4x1xf32>
      %27 = vector.shape_cast %24 : vector<4x1xf32> to vector<1x4x1xf32>
      tpu.vector_store %arg6[%c0_12, %c0_13, %c0_14], %27 {strides = array<i32>} : memref<1x4x1xf32, #tpu.memory_space<vmem>>, vector<1x4x1xf32>,
    } else {
    }
    return
  }
  func.func @transform_0(%arg0: i32, %arg1: i32, %arg2: i32) -> i32 {
    %c0_i32 = arith.constant 0 : i32
    %c0_i32_0 = arith.constant 0 : i32
    return %c0_i32 : i32
  }
  func.func @transform_1(%arg0: i32, %arg1: i32, %arg2: i32) -> i32 {
    %c0_i32 = arith.constant 0 : i32
    %c0_i32_0 = arith.constant 0 : i32
    return %c0_i32 : i32
  }
  func.func @transform_2(%arg0: i32, %arg1: i32, %arg2: i32) -> (i32, i32, i32) {
    %c0_i32 = arith.constant 0 : i32
    return %arg0, %arg1, %arg2 : i32, i32, i32
  }
  func.func @transform_3(%arg0: i32, %arg1: i32, %arg2: i32) -> (i32, i32, i32) {
    %c0_i32 = arith.constant 0 : i32
    %c0_i32_0 = arith.constant 0 : i32
    return %arg0, %arg1, %c0_i32 : i32, i32, i32
  }
}

</mosaic_0001>

<bundles_post_ra>
// kernel: tpu_custom_call.1
= control target key start
LH: loop header
LB: loop body
LE: loop exit
PB: predicated region body
PF: predicated region fallthrough
CT: control target
= control target key end

     0   :  { %s709_s0 = inlined_call_operand.<no memory space> [shape: f32[1], index: 0, kind: input, shape index: {}]   ;;  %s710_s1 = inlined_call_operand.<no memory space> [shape: s32[1], index: 1, kind: input, shape index: {}]   ;;  %s711_s2 = inlined_call_operand.hbm [shape: f32[2,4,256], index: 2, kind: input, shape index: {}]   ;;  %s712_s3 = inlined_call_operand.vmem [shape: f32[2,4,1], index: 3, kind: output, shape index: {}]  }
   0x1   :  { %8 = sst [smem:[#allocation3]] %s709_s0 }
   0x2   :  { %9 = sst [smem:[#allocation4]] %s710_s1 }
   0x3   :  { %10 = vsyncpa [#allocation6], 0 }
   0x4   :  { %12 = vsyncpa [#allocation6 + $0x1], 0  ;;  %s573_s16 = smov 0   ;;  %s575_s17 = smov 0  }
   0x5   :  { %s577_s18 = smov 0   ;;  %s579_s19 = smov 0  }
   0x6   :  { %s581_s20 = smov 0   ;;  %s583_s21 = smov 0  }
   0x7 LB: > { %s382_s0 = sadd.s32 4294967295, %s543_s21   ;;  %s37_s1 = sadd.s32 1, %s539_s20  ;;  %s543_s21 = sphi %s583_s21, %s18_s21   ;;  %s539_s20 = sphi %s581_s20, %s722_s20   ;;  %s535_s19 = sphi %s579_s19, %s721_s19   ;;  %s531_s18 = sphi %s577_s18, %s720_s18   ;;  %s527_s17 = sphi %s575_s17, %s719_s17   ;;  %s523_s16 = sphi %s573_s16, %s718_s16  }
   0x8   : > { %p39_p0 = scmp.ge.s32.totalorder %s37_s1, 2  ;;  %s90_s22 = sadd.s32 1, %s531_s18 }
   0x9   : > { %p97_p1 = scmp.ne.s32.totalorder %s531_s18, %s527_s17  ;;  %p98_p2 = scmp.eq.s32.totalorder %s543_s21, 0 }
   0xa   : > { %s724_s1 = smov (%p39_p0, %s37_s1), 0  ;;  %p103_p4 = scmp.ne.s32.totalorder %s527_s17, %s523_s16 }
   0xb   : > { %p609_p3 = por %p98_p2, %p97_p1  ;;  %s83_s24 = ssub.s32 %s539_s20, %s724_s1 }
   0xc   : > { %p104_p5 = scmp.eq.s32.totalorder %s382_s0, 0  ;;  %p88_p6 = scmp.eq.s32.totalorder %s83_s24, 0 }
   0xd   : > { %p403_p8 = scmp.lt.s32.totalorder %s543_s21, 2  ;;  %s161_s27 = sand.u32 1, %s531_s18  }
   0xe   : > { %p616_p7 = por %p104_p5, %p103_p4  ;;  %s396_s28 = sshll.u32 %s539_s20, 7 }
   0xf   : > { %s622_s26 = scalar_select %p88_p6, %s531_s18, %s90_s22  }
  0x10   : > { %s386_s29 = sshll.u32 %s161_s27, 3  ;;  %s629_s5 = scalar_lea.hbm %s711_s2, %s396_s28 }
  0x11   : > { %s165_s6 = scalar_lea.vmem [#allocation5], %s386_s29  ;;  %p633_p9 = pnand %p403_p8, %p609_p3 }
  0x12   : > { %s177_s7 = sshll.u32 %s165_s6, 4  ;;  %s162_s9 = scalar_lea.sflag [#allocation6], %s161_s27  ;;  %s637_s7 = int_to_ptr.vmem [resolvable:$true] %s177_s7 }
  0x13   : > { %s463_s10 = scalar_lea.hbm %s629_s5, 128  ;;  %p465_p13 = pneg %p633_p9 }
  0x14   : > { %p464_p12 = scmp.ne.s32.totalorder %s629_s5, %s463_s10  ;;  %s468_s13 = scalar_lea.hbm %s711_s2, 256 }
  0x15   : > { %p469_p2 = scmp.lt.u32.totalorder %s629_s5, %s711_s2  ;;  %p470_p3 = scmp.lt.u32.totalorder %s468_s13, %s463_s10 }
  0x16   : > { %p466_p0 = pnand %p465_p13, %p464_p12  ;;  %p472_p5 = scmp.lt.u32.totalorder %s463_s10, %s629_s5 }
  0x17   : > { %p471_p4 = por %p470_p3, %p469_p2 }
  0x18   : > { %p467_p1 = pneg %p466_p0 }
  0x19   : > { %p473_p6 = por %p472_p5, %p471_p4 }
  0x1b   : > { %p474_p8 = pnand %p473_p6, %p467_p1 }
  0x1d   : > { %477 = shalt.err (!%p474_p8)
}
  0x1e   : > { %s478_s16 = scalar_lea.vmem %s637_s7, 128  ;;  %s545_s0 = smov [#allocation5]  }
  0x1f   : > { %p479_p12 = scmp.ne.s32.totalorder %s637_s7, %s478_s16  ;;  %s483_s22 = sshll.u32 %s545_s0, 4  ;;  %s484_s22 = int_to_ptr.vmem [resolvable:$false] %s483_s22 }
  0x20   : > { %s485_s23 = scalar_lea.vmem %s484_s22, 256  ;;  %p486_p11 = scmp.lt.s32.totalorder %s637_s7, %s484_s22 }
  0x21   : > { %p481_p0 = pnand %p479_p12, %p465_p13  ;;  %p487_p2 = scmp.lt.s32.totalorder %s485_s23, %s478_s16 }
  0x23   : > { %p482_p10 = pneg %p481_p0  ;;  %p488_p3 = por %p487_p2, %p486_p11 }
  0x25   : > { %p489_p4 = pnand %p488_p3, %p482_p10 }
  0x27   : > { %492 = shalt.err (!%p489_p4)
}
  0x28   : > { %402 = dma.hbm_to_vmem [thread:$0]  (!%p633_p9), %s629_s5, 128, %s637_s7, %s162_s9  }
  0x29   : > { %p716_p1 = scmp.lt.s32.totalorder %s543_s21, 3  ;;  %p717_p5 = scmp.ge.s32.totalorder %s543_s21, 1 }
  0x2b   : > { %p183_p13 = pnand %p717_p5, %p716_p1 }
  0x2c   : > { %s188_s24 = sand.u32 (!%p183_p13), 1, %s527_s17  }
  0x2d   : > { %186 = sbr.rel (%p183_p13) target bundleno = 432 (0x1b0), region = 32  ;;  %s390_s27 = sshll.u32 (!%p183_p13), %s188_s24, 3 }
  0x2e   : > { %s189_s28 = scalar_lea.sflag (!%p183_p13), [#allocation6], %s188_s24  ;;  %s192_s29 = scalar_lea.vmem (!%p183_p13), [#allocation5], %s390_s27 }
  0x34   : > { %518 = dma.done.wait (%p616_p7), %s189_s28, 128  }
  0x35   : > { %520 = vsyncadd (%p616_p7), %s189_s28, 4294967168  ;;  %p218_p10 = scmp.lt.s32.totalorder %s535_s19, 1  ;;  %vm229_vm0 = vcmask 3072   ;;  %s676_s30 = sld [smem:[#allocation3]]  ;;  %v546_v0 = vmov 0.0   ;;  %v232_v1 = vld [vmem:[%s192_s29] sm:$0xff] }
  0x36   : > { %s234_s4 = sld [smem:[#allocation4]]  ;;  %230 = vst.msk [vmem:[#allocation2] sm:$0xf] %vm229_vm0, %v546_v0  ;;  %v233_v2 = vmax.f32 %v232_v1, 1e-06 }
  0x37   : > { %s726_s19 = smov (!%p218_p10, %s535_s19), 1 }
  0x38   : > { %s391_s5 = sshll.u32 %s726_s19, 2 }
  0x39   : > { %s683_s8 = scalar_lea.vmem %s712_s3, %s391_s5 }
  0x3c   : > { %p392_p7 = scmp.ne.s32.totalorder %s234_s4, 1 }
  0x3d   : > { %v239_v3 = vmul.f32 (!%p392_p7), %v233_v2, %v233_v2  ;;  %vm245_vm1 = vcmask (!%p392_p7), 1043456   ;;  %v241_v9 = vld [vmem:[#allocation2] sm:$0xf] (!%p392_p7) }
  0x3e   : > { %238 = sbr.rel (%p392_p7) target bundleno = 215 (0xd7), region = 44 }
  0x3f   : > { %v240_v4 = vmul.f32 (!%p392_p7), %v239_v3, %v233_v2 }
  0x41   : > { %v243_v5 = vcombine.high (!%p392_p7), %v240_v4, %v240_v4  ;;  %v246_v6 = vsel (!%p392_p7), %vm245_vm1, %v240_v4, 0.0 }
  0x43   : > { %v247_v7 = vsel (!%p392_p7), %vm245_vm1, %v243_v5, 0.0 }
  0x44   : > { %v248_v8 = vadd.f32 (!%p392_p7), %v247_v7, %v246_v6 }
  0x46   : > { %249 = vadd.xlane.f32.xlu0 %v248_v8 }
  0xd3   : > { %v250_v10 = vpop.xlane.xlu0 %249 }
  0xd4   : > { %v251_v11 = vadd.f32 %v250_v10, %v241_v9 }
  0xd6   : > { %253 = vst.msk [vmem:[#allocation2] sm:$0xf] %vm229_vm0, %v251_v11 }
  0xd7 PF: > { %p393_p9 = scmp.eq.s32.totalorder %s234_s4, 1 }
  0xd8   : > { %453 = vlog2.f32 (!%p393_p9), %v233_v2  ;;  %v260_v13 = vstv (!%p393_p9), %s676_s30  ;;  %vm268_vm2 = vcmask (!%p393_p9), 1043456  }
  0xd9   : > { %257 = sbr.rel (%p393_p9) target bundleno = 394 (0x18a), region = 48 }
  0xdd   : > { %v264_v22 = vld [vmem:[#allocation2] sm:$0xf] (!%p393_p9) }
  0xe2   : > { %v454_v12 = vpop.eup %453 }
  0xe3   : > { %v259_v14 = vmul.f32 0.6931472, %v454_v12 }
  0xe5   : > { %v261_v15 = vmul.f32 %v260_v13, %v259_v14 }
  0xe7   : > { %v262_v16 = vmul.f32 1.442695, %v261_v15 }
  0xe9   : > { %455 = vpow2.f32 %v262_v16 }
  0xf3   : > { %v456_v17 = vpop.eup %455 }
  0xf4   : > { %v266_v18 = vcombine.high %v456_v17, %v456_v17  ;;  %v269_v19 = vsel %vm268_vm2, %v456_v17, 0.0 }
  0xf6   : > { %v270_v20 = vsel %vm268_vm2, %v266_v18, 0.0 }
  0xf7   : > { %v271_v21 = vadd.f32 %v270_v20, %v269_v19 }
  0xf9   : > { %272 = vadd.xlane.f32.xlu0 %v271_v21 }
 0x186   : > { %v273_v23 = vpop.xlane.xlu0 %272 }
 0x187   : > { %v274_v24 = vadd.f32 %v273_v23, %v264_v22 }
 0x189   : > { %276 = vst.msk [vmem:[#allocation2] sm:$0xf] %vm229_vm0, %v274_v24 }
 0x18a PF: > { %v284_v26 = vstv %s676_s30 }
 0x18b   : > { %457 = vrcp.f32 %v284_v26 }
 0x190   : > { %v280_v25 = vld [vmem:[#allocation2] sm:$0xf] }
 0x191   : > { %v281_v27 = vmul.f32 0.00390625, %v280_v25 }
 0x193   : > { %459 = vlog2.f32 %v281_v27 }
 0x195   : > { %v458_v28 = vpop.eup %457 }
 0x19d   : > { %v460_v29 = vpop.eup %459 }
 0x19e   : > { %v283_v30 = vmul.f32 0.6931472, %v460_v29 }
 0x1a0   : > { %v286_v31 = vmul.f32 %v458_v28, %v283_v30 }
 0x1a2   : > { %v287_v32 = vmul.f32 1.442695, %v286_v31 }
 0x1a4   : > { %461 = vpow2.f32 %v287_v32 }
 0x1ae   : > { %v462_v33 = vpop.eup %461 }
 0x1af   : > { %290 = vst.msk [vmem:[%s683_s8] sm:$0xf] %vm229_vm0, %v462_v33 }
 0x1b0 PF: > { %s18_s21 = sadd.s32 1, %s543_s21   ;;  %s718_s16 = smov %s527_s17 }
 0x1b1   : > { %p15_p11 = scmp.ge.s32.totalorder %s18_s21, 4   ;;  %s719_s17 = smov %s531_s18 }
 0x1b2   : > { %s720_s18 = smov %s622_s26  ;;  %s721_s19 = smov %s539_s20 }
 0x1b3   : > { %s722_s20 = smov %s724_s1  ;;  %17 = sbr.rel (!%p15_p11) target bundleno = 7 (0x7), region = 88 }
 0x1ba   :  { %316 = vsyncpa [#allocation6], 1 }
 0x1bb   :  { %318 = vsyncpa [#allocation6 + $0x1], 1 }

</bundles_post_ra>
